<compile_context>
chip_gen: v7x
topology: tpu7x:2x2x1
jax: 0.10.0
libtpu: 0.0.40
codegen_flags: <defaults>
</compile_context>

<pallas_src>
import functools

import jax
import jax.numpy as jnp
from jax.experimental import pallas as pl
from jax.experimental.pallas import tpu as pltpu

_EPS = 1e-6  # matches F.pairwise_distance default eps


def _triplet_loss_kernel(m_ref, q_ref, out_ref, acc_ref, *,
                         n_rows, tile_n, needs_mask):
    i = pl.program_id(0)

    @pl.when(i == 0)
    def _():
        acc_ref[...] = jnp.zeros_like(acc_ref)

    # Upcast in-kernel: callers may keep bf16 in HBM (half the DMA bytes),
    # all arithmetic stays f32.
    diff = m_ref[...].astype(jnp.float32) - q_ref[...].astype(jnp.float32) + _EPS
    row_sumsq = jnp.sum(diff * diff, axis=-1, keepdims=True)   # (tile_n, 1)  XLU
    dist = jnp.sqrt(row_sumsq)                                 # (tile_n, 1)  EUP

    if needs_mask:
        # Last grid block may extend past N; zero the padded rows.
        row_ids = i * tile_n + jax.lax.broadcasted_iota(jnp.int32, (tile_n, 1), 0)
        dist = jnp.where(row_ids < n_rows, dist, 0.0)

    acc_ref[...] += jnp.sum(dist).reshape(1, 1)

    @pl.when(i == pl.num_programs(0) - 1)
    def _():
        out_ref[...] = acc_ref[...]


def triplet_loss(m, q, labels=None, margin=0.8):
    """Pallas implementation of TripletLoss.forward (labels/margin unused)."""
    del labels, margin  # the module's forward never uses them
    n, d = m.shape

    # Block sizing: keep one f32 block <= 8 MiB so 2 inputs x 2 pipeline
    # buffers stay <= 32 MiB (safe on v7x 64 MiB VMEM; well under v5e/v6e).
    max_block_elems = (8 * 1024 * 1024) // 4
    tile_n = max(32, min(8192, (max_block_elems // max(d, 1)) // 32 * 32))
    if tile_n >= n:
        tile_n = n  # single full-dim block (allowed regardless of (8,128) rule)
    grid_n = pl.cdiv(n, tile_n)
    needs_mask = (n % tile_n) != 0

    kernel = functools.partial(
        _triplet_loss_kernel, n_rows=n, tile_n=tile_n, needs_mask=needs_mask)

    out = pl.pallas_call(
        kernel,
        out_shape=jax.ShapeDtypeStruct((1, 1), jnp.float32),
        grid_spec=pltpu.PrefetchScalarGridSpec(
            num_scalar_prefetch=0,
            grid=(grid_n,),
            in_specs=[
                pl.BlockSpec((tile_n, d), lambda i: (i, 0)),
                pl.BlockSpec((tile_n, d), lambda i: (i, 0)),
            ],
            # Output block fixed across the reduce axis -> stays resident.
            out_specs=pl.BlockSpec((1, 1), lambda i: (0, 0)),
            scratch_shapes=[pltpu.VMEM((1, 1), jnp.float32)],
        ),
        compiler_params=pltpu.CompilerParams(
            dimension_semantics=("arbitrary",),        # reduction axis
            vmem_limit_bytes=48 * 1024 * 1024,         # above v5e's 16 MiB default
        ),
    )(m, q)
    return out[0, 0]


def _reference(m, q):
    diff = m.astype(jnp.float32) - q.astype(jnp.float32) + _EPS
    return jnp.sum(jnp.sqrt(jnp.sum(diff * diff, axis=-1)))


if __name__ == "__main__":
    key = jax.random.PRNGKey(0)
    k_m, k_q, k_l = jax.random.split(key, 3)

    N, D = 8, 32  # small (batch, feature) shapes consistent with forward()
    m = jax.random.normal(k_m, (N, D), dtype=jnp.float32)
    q = jax.random.normal(k_q, (N, D), dtype=jnp.float32)
    labels = jax.random.randint(k_l, (N,), 0, 4)  # unused by the module

    # f32 path (matches PyTorch defaults exactly)
    loss = triplet_loss(m, q, labels)
    jax.block_until_ready(loss)
    ref = _reference(m, q)
    assert jnp.allclose(loss, ref, rtol=1e-5, atol=1e-5), (loss, ref)

    # bf16 inputs exercise the halved-HBM-traffic path (compute stays f32).
    m_bf16 = m.astype(jnp.bfloat16)
    q_bf16 = q.astype(jnp.bfloat16)
    loss_bf16 = triplet_loss(m_bf16, q_bf16, labels)
    jax.block_until_ready(loss_bf16)
    ref_bf16 = _reference(m_bf16.astype(jnp.float32), q_bf16.astype(jnp.float32))
    assert jnp.allclose(loss_bf16, ref_bf16, rtol=1e-5, atol=1e-5), (loss_bf16, ref_bf16)

    print("KERNEL_OK")
</pallas_src>

<mosaic_0001>
module attributes {stable_mosaic.version = 11 : i64} {
  func.func @_triplet_loss_kernel(%arg0: i32, %arg1: memref<8x32xf32, #tpu.memory_space<vmem>>, %arg2: memref<8x32xf32, #tpu.memory_space<vmem>>, %arg3: memref<1x1xf32, #tpu.memory_space<vmem>>, %arg4: memref<1x1xf32, #tpu.memory_space<vmem>>) attributes {dimension_semantics = [#tpu.dimension_semantics<arbitrary>], iteration_bounds = array<i64: 1>, scalar_prefetch = 0 : i64, scratch_operands = 1 : i64, tpu.core_type = #tpu.core_type<tc>, window_params = [{transform_indices = @transform_0, window_bounds = array<i64: 8, 32>}, {transform_indices = @transform_1, window_bounds = array<i64: 8, 32>}, {pipeline_mode = #tpu.pipeline_mode<synchronous>, transform_indices = @transform_2, window_bounds = array<i64: 1, 1>}]} {
    %c0_i32 = arith.constant 0 : i32
    %0 = arith.cmpi eq, %arg0, %c0_i32 : i32
    %1 = arith.extui %0 : i1 to i32
    %c0_i32_0 = arith.constant 0 : i32
    %2 = arith.cmpi ne, %1, %c0_i32_0 : i32
    scf.if %2 {
      %cst_12 = arith.constant 0.000000e+00 : f32
      %23 = vector.broadcast %cst_12 : f32 to vector<1x1xf32>
      %c0_13 = arith.constant 0 : index
      %c0_14 = arith.constant 0 : index
      %24 = vector.load %arg4[%c0_13, %c0_14] : memref<1x1xf32, #tpu.memory_space<vmem>>, vector<1x1xf32>
      tpu.vector_store %arg4[%c0_13, %c0_14], %23 {strides = array<i32>} : memref<1x1xf32, #tpu.memory_space<vmem>>, vector<1x1xf32>,
    } else {
    }
    %c0 = arith.constant 0 : index
    %c0_1 = arith.constant 0 : index
    %3 = vector.load %arg1[%c0, %c0_1] : memref<8x32xf32, #tpu.memory_space<vmem>>, vector<8x32xf32>
    %c0_2 = arith.constant 0 : index
    %c0_3 = arith.constant 0 : index
    %4 = vector.load %arg2[%c0_2, %c0_3] : memref<8x32xf32, #tpu.memory_space<vmem>>, vector<8x32xf32>
    %5 = arith.subf %3, %4 : vector<8x32xf32>
    %cst = arith.constant 9.99999997E-7 : f32
    %6 = vector.broadcast %cst : f32 to vector<8x32xf32>
    %7 = arith.addf %5, %6 : vector<8x32xf32>
    %8 = arith.mulf %7, %7 : vector<8x32xf32>
    %cst_4 = arith.constant dense<0.000000e+00> : vector<8xf32>
    %9 = vector.multi_reduction <add>, %8, %cst_4 [1] : vector<8x32xf32> to vector<8xf32>
    %10 = vector.shape_cast %9 : vector<8xf32> to vector<8x1xf32>
    %11 = math.sqrt %10 : vector<8x1xf32>
    %c0_5 = arith.constant 0 : index
    %c0_6 = arith.constant 0 : index
    %12 = vector.load %arg4[%c0_5, %c0_6] : memref<1x1xf32, #tpu.memory_space<vmem>>, vector<1x1xf32>
    %13 = vector.shape_cast %11 : vector<8x1xf32> to vector<1x8x1xf32>
    %cst_7 = arith.constant dense<0.000000e+00> : vector<1xf32>
    %14 = vector.multi_reduction <add>, %13, %cst_7 [1, 2] : vector<1x8x1xf32> to vector<1xf32>
    %15 = vector.shape_cast %14 : vector<1xf32> to vector<1x1x1xf32>
    %16 = vector.extract %15[0, 0, 0] : f32 from vector<1x1x1xf32>
    %17 = vector.broadcast %16 : f32 to vector<1x1xf32>
    %18 = arith.addf %12, %17 : vector<1x1xf32>
    %c0_8 = arith.constant 0 : index
    %c0_9 = arith.constant 0 : index
    %19 = vector.load %arg4[%c0_8, %c0_9] : memref<1x1xf32, #tpu.memory_space<vmem>>, vector<1x1xf32>
    tpu.vector_store %arg4[%c0_8, %c0_9], %18 {strides = array<i32>} : memref<1x1xf32, #tpu.memory_space<vmem>>, vector<1x1xf32>,
    %c0_i32_10 = arith.constant 0 : i32
    %20 = arith.cmpi eq, %arg0, %c0_i32_10 : i32
    %21 = arith.extui %20 : i1 to i32
    %c0_i32_11 = arith.constant 0 : i32
    %22 = arith.cmpi ne, %21, %c0_i32_11 : i32
    scf.if %22 {
      %c0_12 = arith.constant 0 : index
      %c0_13 = arith.constant 0 : index
      %23 = vector.load %arg4[%c0_12, %c0_13] : memref<1x1xf32, #tpu.memory_space<vmem>>, vector<1x1xf32>
      %c0_14 = arith.constant 0 : index
      %c0_15 = arith.constant 0 : index
      %24 = vector.load %arg3[%c0_14, %c0_15] : memref<1x1xf32, #tpu.memory_space<vmem>>, vector<1x1xf32>
      tpu.vector_store %arg3[%c0_14, %c0_15], %23 {strides = array<i32>} : memref<1x1xf32, #tpu.memory_space<vmem>>, vector<1x1xf32>,
    } else {
    }
    return
  }
  func.func @transform_0(%arg0: i32) -> (i32, i32) {
    %c0_i32 = arith.constant 0 : i32
    %c0_i32_0 = arith.constant 0 : i32
    return %arg0, %c0_i32 : i32, i32
  }
  func.func @transform_1(%arg0: i32) -> (i32, i32) {
    %c0_i32 = arith.constant 0 : i32
    %c0_i32_0 = arith.constant 0 : i32
    return %arg0, %c0_i32 : i32, i32
  }
  func.func @transform_2(%arg0: i32) -> (i32, i32) {
    %c0_i32 = arith.constant 0 : i32
    %c0_i32_0 = arith.constant 0 : i32
    %c0_i32_1 = arith.constant 0 : i32
    return %c0_i32, %c0_i32_0 : i32, i32
  }
}

</mosaic_0001>

<bundles_post_ra>
// kernel: tpu_custom_call.1
= control target key start
LH: loop header
LB: loop body
LE: loop exit
PB: predicated region body
PF: predicated region fallthrough
CT: control target
= control target key end

     0   :  { %7 = vsyncpa [#allocation4], 0  ;;  %s233_s0 = inlined_call_operand.hbm [shape: f32[8,32], index: 0, kind: input, shape index: {}]   ;;  %s234_s1 = inlined_call_operand.hbm [shape: f32[8,32], index: 1, kind: input, shape index: {}]   ;;  %s235_s2 = inlined_call_operand.hbm [shape: f32[1,1], index: 2, kind: output, shape index: {}]  }
   0x1   :  { %8 = vsyncpa [#allocation7], 0 }
   0x2   :  { %9 = vsyncpa [#allocation5], 0  ;;  %s175_s9 = smov [#allocation3]   ;;  %s176_s11 = smov [#allocation6]  }
   0x3   :  { %s16_s10 = sshll.u32 %s175_s9, 4  ;;  %s26_s12 = sshll.u32 %s176_s11, 4  ;;  %s17_s10 = int_to_ptr.vmem [resolvable:$true] %s16_s10  ;;  %s27_s12 = int_to_ptr.vmem [resolvable:$true] %s26_s12 }
   0x4   :  { %s103_s15 = scalar_lea.hbm %s233_s0, 128 }
   0x5   :  { %p104_p0 = scmp.ne.s32.totalorder %s233_s0, %s103_s15  ;;  %p107_p1 = scmp.lt.u32.totalorder %s103_s15, %s233_s0 }
   0x7   :  { %p109_p2 = pnand %p107_p1, %p104_p0 }
   0x9   :  { %112 = shalt.err (!%p109_p2)
}
   0xa   :  { %s113_s20 = scalar_lea.vmem %s17_s10, 128  ;;  %p118_p4 = scmp.lt.s32.totalorder %s17_s10, %s17_s10 }
   0xb   :  { %p114_p3 = scmp.ne.s32.totalorder %s17_s10, %s113_s20  ;;  %p119_p5 = scmp.lt.s32.totalorder %s113_s20, %s113_s20 }
   0xd   :  { %p120_p6 = por %p119_p5, %p118_p4 }
   0xf   :  { %p121_p7 = pnand %p120_p6, %p114_p3 }
  0x11   :  { %124 = shalt.err (!%p121_p7)
}
  0x12   :  { %19 = dma.hbm_to_vmem [thread:$0]  %s233_s0, 128, %s17_s10, [#allocation4]  }
  0x13   :  { %s125_s25 = scalar_lea.hbm %s234_s1, 128 }
  0x14   :  { %p126_p8 = scmp.ne.s32.totalorder %s234_s1, %s125_s25  ;;  %p129_p9 = scmp.lt.u32.totalorder %s125_s25, %s234_s1 }
  0x16   :  { %p131_p10 = pnand %p129_p9, %p126_p8 }
  0x18   :  { %134 = shalt.err (!%p131_p10)
}
  0x19   :  { %s135_s30 = scalar_lea.vmem %s27_s12, 128  ;;  %p140_p12 = scmp.lt.s32.totalorder %s27_s12, %s27_s12 }
  0x1a   :  { %p136_p11 = scmp.ne.s32.totalorder %s27_s12, %s135_s30  ;;  %p141_p13 = scmp.lt.s32.totalorder %s135_s30, %s135_s30 }
  0x1c   :  { %p142_p0 = por %p141_p13, %p140_p12 }
  0x1e   :  { %p143_p1 = pnand %p142_p0, %p136_p11 }
  0x20   :  { %146 = shalt.err (!%p143_p1)
}
  0x21   :  { %29 = dma.hbm_to_vmem [thread:$0]  %s234_s1, 128, %s27_s12, [#allocation7]  }
  0x22   :  { %169 = dma.done.wait [#allocation4], 128  }
  0x23   :  { %170 = vsyncadd [#allocation4], 4294967168 }
  0x24   :  { %171 = dma.done.wait [#allocation7], 128  }
  0x25   :  { %172 = vsyncadd [#allocation7], 4294967168  ;;  %v42_v0 = vld [vmem:[#allocation3] sm:$0xff]  ;;  %v43_v1 = vld [vmem:[#allocation6] sm:$0xff]  ;;  %vm47_vm0 = vcmask 261120   ;;  %vm59_vm2 = vcmask 7168  }
  0x26   :  { %v44_v2 = vsub.f32 %v42_v0, %v43_v1  ;;  %vm40_vm4 = vcmask 0   ;;  %v177_v13 = vmov 0.0   ;;  %s178_s4 = smov [#allocation8]  }
  0x27   :  { %41 = vst.msk [vmem:[#allocation2] sm:$0x1] %vm40_vm4, %v177_v13  ;;  %s85_s5 = sshll.u32 %s178_s4, 4  ;;  %s86_s5 = int_to_ptr.vmem [resolvable:$true] %s85_s5 }
  0x28   :  { %v45_v3 = vadd.f32 1e-06, %v44_v2  ;;  %s147_s6 = scalar_lea.vmem %s86_s5, 16  ;;  %s151_s7 = scalar_lea.vmem %s86_s5, 32 }
  0x29   :  { %p148_p2 = scmp.ne.s32.totalorder %s86_s5, %s147_s6  ;;  %p152_p3 = scmp.lt.s32.totalorder %s86_s5, %s86_s5 }
  0x2a   :  { %v46_v4 = vmul.f32 %v45_v3, %v45_v3  ;;  %p153_p4 = scmp.lt.s32.totalorder %s151_s7, %s147_s6 }
  0x2c   :  { %v48_v5 = vsel %vm47_vm0, %v46_v4, 0.0  ;;  %p154_p5 = por %p153_p4, %p152_p3 }
  0x2d   :  { %49 = vadd.xlane.f32.xlu0 %v48_v5 }
  0x2e   :  { %v58_v21 = vld [vmem:[#allocation2] sm:$0x1]  ;;  %p155_p6 = pnand %p154_p5, %p148_p2 }
  0xba   :  { %v50_v6 = vpop.xlane.xlu0 %49 }
  0xbb   :  { %101 = vrsqrt.f32 %v50_v6  ;;  %vm53_vm1 = vcmp.eq.f32.partialorder %v50_v6, inf  ;;  %v56_v9 = vand.u32 2147483648, %v50_v6  ;;  %vm55_vm3 = vcmp.eq.f32.partialorder %v50_v6, 0.0 }
  0xc5   :  { %v102_v7 = vpop.eup %101 }
  0xc6   :  { %v52_v8 = vmul.f32 %v102_v7, %v50_v6 }
  0xc8   :  { %v54_v10 = vsel %vm53_vm1, %v50_v6, %v52_v8 }
  0xc9   :  { %v57_v11 = vsel %vm55_vm3, %v56_v9, %v54_v10 }
  0xca   :  { %v60_v12 = vsel %vm59_vm2, %v57_v11, 0.0 }
  0xcb   :  { %61 = vadd.xlane.f32.xlu0 %v60_v12 }
 0x158   :  { %v62_v14 = vpop.xlane.xlu0 %61 }
 0x159   :  { %v63_v15 = vrot.slane %v62_v14, 4 }
 0x15b   :  { %v64_v16 = vadd.f32 %v63_v15, %v62_v14 }
 0x15d   :  { %v65_v17 = vrot.slane %v64_v16, 2 }
 0x15f   :  { %v66_v18 = vadd.f32 %v65_v17, %v64_v16 }
 0x161   :  { %v67_v19 = vrot.slane %v66_v18, 1 }
 0x163   :  { %v68_v20 = vadd.f32 %v67_v19, %v66_v18 }
 0x165   :  { %95 = vpush %v68_v20 }
 0x196   :  { %s96_s1 = spop %95 }
 0x197   :  { %v70_v22 = vstv %s96_s1 }
 0x198   :  { %v71_v23 = vadd.f32 %v70_v22, %v58_v21 }
 0x19a   :  { %73 = vst.msk [vmem:[#allocation2] sm:$0x1] %vm40_vm4, %v71_v23 }
 0x1a1   :  { %v77_v24 = vld [vmem:[#allocation2] sm:$0x1] }
 0x1a2   :  { %78 = vst.msk [vmem:[#allocation8] sm:$0x1] %vm40_vm4, %v77_v24 }
 0x1a3   :  { %158 = shalt.err (!%p155_p6)
}
 0x1a4   :  { %s159_s10 = scalar_lea.hbm %s235_s2, 16 }
 0x1a5   :  { %p160_p7 = scmp.ne.s32.totalorder %s235_s2, %s159_s10  ;;  %p163_p8 = scmp.lt.u32.totalorder %s159_s10, %s235_s2 }
 0x1a7   :  { %p165_p9 = pnand %p163_p8, %p160_p7 }
 0x1a9   :  { %168 = shalt.err (!%p165_p9)
}
 0x1aa   :  { %88 = dma.vmem_to_hbm [thread:$0]  %s86_s5, 16, %s235_s2, [#allocation5]  }
 0x1ab   :  { %173 = dma.done.wait [#allocation5], 16  }
 0x1ac   :  { %174 = vsyncadd [#allocation5], 4294967280 }
 0x1ad   :  { %92 = vsyncpa [#allocation4], 1 }
 0x1ae   :  { %93 = vsyncpa [#allocation7], 1 }
 0x1af   :  { %94 = vsyncpa [#allocation5], 1 }

</bundles_post_ra>
